<compile_context>
chip_gen: v6e
topology: v6e:2x2x1
jax: 0.10.0
libtpu: 0.0.40
codegen_flags: <defaults>
</compile_context>

<pallas_src>
import functools
import math

import numpy as np

import jax
import jax.numpy as jnp
from jax.experimental import pallas as pl
from jax.experimental.pallas import tpu as pltpu


# Static model constants (torch buffers / fixed nn.Parameter init values).
_CFG = dict(
    # AdaptiveLIFNeuron
    tau_m=20.0, tau_adapt=100.0, v_rest=-65.0, v_thresh=-50.0, v_reset=-65.0,
    adapt_a=0.5, adapt_b=0.1, delta_T=2.0, v_T=-55.0,
    # IonicCurrents
    g_Na=120.0, g_K=36.0, g_L=0.3, E_Na=50.0, E_K=-77.0, E_L=-54.4,
    m0=0.05, h0=0.6, n0=0.32,
    # Layer
    tau_syn=5.0,
)

_LANE = 128
_EXP_NEG_HALF = math.exp(-0.5)   # exp(-(V+40)/10) == e10 * exp(-0.5)
_EXP_NEG_TWO = math.exp(-2.0)    # exp(-(V+55)/10) == e10 * exp(-2.0)


def _round_up(x, m):
    return ((x + m - 1) // m) * m


def _cdiv(a, b):
    return -(-a // b)


def _bio_snn_kernel(x_ref, wt_ref, spike_ref, volt_ref, adapt_ref, *,
                    dt, cfg, approx_recip):
    c = cfg
    f32 = jnp.float32

    def rcp(d):
        return pl.reciprocal(d, approx=approx_recip)

    # --- SynapticPlasticity linear: psp = x @ W.T (weight pre-transposed and
    # resident in VMEM).  psp state is 0 on a fresh module so V == syn_input,
    # and the STDP weight update is exactly zero.  f32 MXU accumulation.
    V = jnp.dot(x_ref[...].astype(wt_ref.dtype), wt_ref[...],
                preferred_element_type=f32)

    # --- IonicCurrents: one Euler step of the HH gating variables from their
    # fixed initial values, then the ionic currents.
    # EUP relief: 6 exps -> 3 shared exps
    #   e10 = exp(-(V+35)/10): exp(-(V+40)/10)=e10*e^-0.5, exp(-(V+55)/10)=e10*e^-2,
    #                          b_h = 1/(1+e10)
    #   e80 = exp(-(V+65)/80): exp(-(V+65)/20)=e80^4, b_n = 0.125*e80
    #   e18 = exp(-(V+65)/18): b_m = 4*e18
    # Divisions become approximate-reciprocal multiplies (EUP vrcp).
    # NOTE: a_m/a_n keep the torch reference's removable 0/0 singularity at
    # V == -40 / -55 (inputs here never reach it).
    e10 = jnp.exp((V + 35.0) * -0.1)
    e18 = jnp.exp((V + 65.0) * (-1.0 / 18.0))
    e80 = jnp.exp((V + 65.0) * -0.0125)

    # m gate -> m^3 (consume each gate immediately to limit live temporaries)
    a_m = 0.1 * (V + 40.0) * rcp(1.0 - e10 * _EXP_NEG_HALF)
    b_m = 4.0 * e18
    m = c["m0"] + dt * (a_m * (1.0 - c["m0"]) - b_m * c["m0"])
    m3 = m * m * m

    # h gate -> I_Na
    e80_2 = e80 * e80
    a_h = 0.07 * (e80_2 * e80_2)
    b_h = rcp(1.0 + e10)
    h = c["h0"] + dt * (a_h * (1.0 - c["h0"]) - b_h * c["h0"])
    I_Na = c["g_Na"] * m3 * h * (V - c["E_Na"])

    # n gate -> I_K, I_L
    a_n = 0.01 * (V + 55.0) * rcp(1.0 - e10 * _EXP_NEG_TWO)
    b_n = 0.125 * e80
    n = c["n0"] + dt * (a_n * (1.0 - c["n0"]) - b_n * c["n0"])
    n2 = n * n
    I_K = c["g_K"] * (n2 * n2) * (V - c["E_K"])
    I_L = c["g_L"] * (V - c["E_L"])

    # --- AdaptiveLIF one step from fresh state (v = v_rest, w = 0); all
    # hidden neurons share params so the torch per-neuron loop collapses.
    I_in = I_Na + I_K + I_L + V
    exp_term = c["delta_T"] * math.exp((c["v_rest"] - c["v_T"]) / c["delta_T"])
    dv = (exp_term + I_in) * (dt / c["tau_m"])     # -(v-v_rest) and -w are 0
    v_new = c["v_rest"] + dv
    spike = (v_new >= c["v_thresh"]).astype(f32)
    dw = (c["adapt_a"] * dv + c["adapt_b"] * spike) * (dt / c["tau_adapt"])
    v_rs = jnp.where(spike > 0.5, c["v_reset"], v_new)

    spike_ref[...] = spike.astype(spike_ref.dtype)
    volt_ref[...] = v_rs.astype(volt_ref.dtype)
    adapt_ref[...] = dw.astype(adapt_ref.dtype)


def biological_snn_forward(x, params, *, dt=0.1, tm=256,
                           spike_dtype=jnp.bfloat16,
                           volt_dtype=None, adapt_dtype=None,
                           approx_recip=True,
                           vmem_budget_bytes=40 * 1024 * 1024):
    """x: (batch, seq, input_size) -> (spikes, voltages, adaptations),
    each (batch, seq, hidden_size)."""
    B, S, In = x.shape
    wt = params["W_syn_t"]                  # (In, Hp): pre-transposed, lane-padded
    H = int(params.get("hidden_size", wt.shape[1]))
    Hp = wt.shape[1]
    assert wt.shape[0] == In

    # Spikes are exactly {0,1} -> bf16 output is lossless and halves that
    # output's writeback.  Voltages/adaptations default to x.dtype; pass bf16
    # on v5e to relieve HBM BW / the single vst slot further.
    volt_dtype = x.dtype if volt_dtype is None else volt_dtype
    adapt_dtype = x.dtype if adapt_dtype is None else adapt_dtype
    out_dtypes = (spike_dtype, volt_dtype, adapt_dtype)

    M = B * S
    x2 = x.reshape(M, In)

    # Row-tile granularity: 16 sublanes when any operand is 16-bit (packed
    # sublanes), else 8.
    all_dts = out_dtypes + (x.dtype, wt.dtype)
    gran = 16 if any(np.dtype(d).itemsize < 4 for d in all_dts) else 8

    # Derive tm from a VMEM budget (v7x: 64 MiB physical / 32 MiB scoped
    # default).  Resident ~ 2 x-buffers + 2x three output buffers + the
    # single-buffered weight + f32 temporaries.
    x_b = np.dtype(x.dtype).itemsize
    w_bytes = In * Hp * np.dtype(wt.dtype).itemsize
    out_b = sum(np.dtype(d).itemsize for d in out_dtypes)
    per_row = 2 * In * x_b + 2 * Hp * out_b + 8 * Hp * 4
    avail = max(vmem_budget_bytes - w_bytes, per_row * gran)
    tm_eff = min(int(tm), max(gran, (avail // per_row) // gran * gran))
    # >= 2 grid steps when possible so both v7x TensorCores get work.
    tm_eff = min(tm_eff, _round_up(_cdiv(M, 2), gran))
    tm_eff = max(gran, min(tm_eff, _round_up(M, gran)))
    if M < gran:
        tm_eff = M                           # single full-extent (tiny) block

    # No wrapper-side pad/crop of rows: ragged last block is masked by Pallas.
    n_rows = _cdiv(M, tm_eff)

    vmem_limit = int(min(64 * 1024 * 1024,
                         max(32 * 1024 * 1024,
                             int((w_bytes + tm_eff * per_row) * 1.5))))

    kernel = functools.partial(_bio_snn_kernel, dt=float(dt), cfg=_CFG,
                               approx_recip=approx_recip)

    out_shape = tuple(jax.ShapeDtypeStruct((M, Hp), d) for d in out_dtypes)
    x_spec = pl.BlockSpec((tm_eff, In), lambda i: (i, 0))
    out_specs = tuple(pl.BlockSpec((tm_eff, Hp), lambda i: (i, 0))
                      for _ in range(3))

    def _call(resident_weight):
        if resident_weight:
            # Whole weight lives in VMEM once: single buffer, no per-step DMA
            # (halves the weight footprint vs. a double-buffered block).
            w_spec = pl.BlockSpec(memory_space=pltpu.MemorySpace.VMEM)
        else:
            # Fallback: blocked spec with a constant index_map (copied once,
            # but double-buffered).
            w_spec = pl.BlockSpec((In, Hp), lambda i: (0, 0))
        return pl.pallas_call(
            kernel,
            out_shape=out_shape,
            grid_spec=pltpu.PrefetchScalarGridSpec(
                num_scalar_prefetch=0,
                grid=(n_rows,),
                in_specs=[x_spec, w_spec],
                out_specs=out_specs,
            ),
            compiler_params=pltpu.CompilerParams(
                dimension_semantics=("parallel",),
                vmem_limit_bytes=vmem_limit),
        )(x2, wt)

    try:
        spikes, volts, adapts = _call(True)
    except Exception:
        # Older/stricter lowerings may reject an un-blocked VMEM operand with a
        # grid; retry with the (known-good) blocked resident weight spec.
        spikes, volts, adapts = _call(False)

    def _crop(a):
        a = a if Hp == H else a[:, :H]       # drop lane-padding columns
        return a.reshape(B, S, H)

    return _crop(spikes), _crop(volts), _crop(adapts)


def init_params(key, input_size, hidden_size, *, mxu_dtype=jnp.bfloat16,
                lane_pad=True):
    # torch: SynapticPlasticity.weights = randn(hidden, input) * 0.01
    W = jax.random.normal(key, (hidden_size, input_size), jnp.float32) * 0.01
    # Pre-transpose ONCE so the kernel issues a plain x @ W_t (no per-call W.T).
    Wt = W.T                                 # (In, H)
    Hp = _round_up(hidden_size, _LANE) if lane_pad else hidden_size
    if Hp != hidden_size:
        # Lane-dense output tiles: pad hidden to a multiple of 128 with zero
        # columns once at init; the forward crops the padded columns.
        Wt = jnp.pad(Wt, ((0, 0), (0, Hp - hidden_size)))
    if mxu_dtype is not None:
        # bf16 MXU inputs on v5e/v6e/v7x (accumulation stays f32 in-kernel).
        Wt = Wt.astype(mxu_dtype)
    return {"W_syn_t": Wt, "hidden_size": hidden_size}


def _reference(x, params, dt=0.1):
    """Pure-JAX (f32) mirror of BiologicalSNNLayer.forward on a fresh module."""
    c = _CFG
    H = int(params["hidden_size"])
    wt = params["W_syn_t"][:, :H].astype(jnp.float32)
    V = jnp.einsum("bsi,ih->bsh", x.astype(jnp.float32), wt)   # psp (state 0)
    a_m = 0.1 * (V + 40.0) / (1.0 - jnp.exp(-(V + 40.0) / 10.0))
    b_m = 4.0 * jnp.exp(-(V + 65.0) / 18.0)
    a_h = 0.07 * jnp.exp(-(V + 65.0) / 20.0)
    b_h = 1.0 / (1.0 + jnp.exp(-(V + 35.0) / 10.0))
    a_n = 0.01 * (V + 55.0) / (1.0 - jnp.exp(-(V + 55.0) / 10.0))
    b_n = 0.125 * jnp.exp(-(V + 65.0) / 80.0)
    m = c["m0"] + dt * (a_m * (1.0 - c["m0"]) - b_m * c["m0"])
    h = c["h0"] + dt * (a_h * (1.0 - c["h0"]) - b_h * c["h0"])
    n = c["n0"] + dt * (a_n * (1.0 - c["n0"]) - b_n * c["n0"])
    I_ion = (c["g_Na"] * m ** 3 * h * (V - c["E_Na"])
             + c["g_K"] * n ** 4 * (V - c["E_K"])
             + c["g_L"] * (V - c["E_L"]))
    I_in = I_ion + V
    exp_term = c["delta_T"] * math.exp((c["v_rest"] - c["v_T"]) / c["delta_T"])
    dv = (exp_term + I_in) * (dt / c["tau_m"])
    v_new = c["v_rest"] + dv
    spike = (v_new >= c["v_thresh"]).astype(jnp.float32)
    dw = (c["adapt_a"] * (v_new - c["v_rest"])
          + c["adapt_b"] * spike) * (dt / c["tau_adapt"])
    v_rs = jnp.where(spike > 0.5, c["v_reset"], v_new)
    return spike, v_rs, dw


if __name__ == "__main__":
    batch, seq, input_size, hidden = 2, 8, 32, 32
    key = jax.random.PRNGKey(0)
    k_x, k_w = jax.random.split(key)

    x = jax.random.normal(k_x, (batch, seq, input_size), jnp.float32)
    params = init_params(k_w, input_size, hidden)

    spikes, volts, adapts = biological_snn_forward(x, params, dt=0.1)
    jax.block_until_ready((spikes, volts, adapts))

    r_spikes, r_volts, r_adapts = _reference(x, params, dt=0.1)
    assert spikes.shape == (batch, seq, hidden)
    assert volts.shape == (batch, seq, hidden)
    assert adapts.shape == (batch, seq, hidden)
    # Spikes are exact {0,1}; voltage/adaptation tolerances cover the bf16 MXU
    # inputs and the approximate EUP reciprocals (values are ~-66 mV / ~6e-4).
    assert jnp.array_equal(spikes.astype(jnp.float32), r_spikes), "spike mismatch"
    assert jnp.allclose(volts.astype(jnp.float32), r_volts, atol=5e-2), \
        "voltage mismatch"
    assert jnp.allclose(adapts.astype(jnp.float32), r_adapts, atol=1e-4), \
        "adaptation mismatch"

    print("KERNEL_OK")
</pallas_src>

<mosaic_0001>
module attributes {stable_mosaic.version = 11 : i64} {
  func.func @_bio_snn_kernel(%arg0: i32, %arg1: memref<16x32xf32, #tpu.memory_space<vmem>>, %arg2: memref<32x128xbf16, #tpu.memory_space<vmem>>, %arg3: memref<16x128xbf16, #tpu.memory_space<vmem>>, %arg4: memref<16x128xf32, #tpu.memory_space<vmem>>, %arg5: memref<16x128xf32, #tpu.memory_space<vmem>>) attributes {dimension_semantics = [#tpu.dimension_semantics<parallel>], iteration_bounds = array<i64: 1>, scalar_prefetch = 0 : i64, scratch_operands = 0 : i64, tpu.core_type = #tpu.core_type<tc>, window_params = [{transform_indices = @transform_0, window_bounds = array<i64: 16, 32>}, {pipeline_mode = #tpu.pipeline_mode<synchronous>, transform_indices = @transform_1, window_bounds = array<i64: 32, 128>}, {transform_indices = @transform_2, window_bounds = array<i64: 16, 128>}, {transform_indices = @transform_3, window_bounds = array<i64: 16, 128>}, {transform_indices = @transform_4, window_bounds = array<i64: 16, 128>}]} {
    %c0 = arith.constant 0 : index
    %c0_0 = arith.constant 0 : index
    %0 = vector.load %arg1[%c0, %c0_0] : memref<16x32xf32, #tpu.memory_space<vmem>>, vector<16x32xf32>
    %1 = arith.truncf %0 : vector<16x32xf32> to vector<16x32xbf16>
    %c0_1 = arith.constant 0 : index
    %c0_2 = arith.constant 0 : index
    %2 = vector.load %arg2[%c0_1, %c0_2] : memref<32x128xbf16, #tpu.memory_space<vmem>>, vector<32x128xbf16>
    %cst = arith.constant dense<0.000000e+00> : vector<16x128xf32>
    %3 = tpu.matmul %1, %2, %cst {dimension_numbers = #tpu.dot_dimension_numbers<[1], [0], [0], [1], [0, 0, 1, 1], [], []>} : vector<16x32xbf16>, vector<32x128xbf16>, vector<16x128xf32> -> vector<16x128xf32>
    %cst_3 = arith.constant 3.500000e+01 : f32
    %4 = vector.broadcast %cst_3 : f32 to vector<16x128xf32>
    %5 = arith.addf %3, %4 : vector<16x128xf32>
    %cst_4 = arith.constant -1.000000e-01 : f32
    %6 = vector.broadcast %cst_4 : f32 to vector<16x128xf32>
    %7 = arith.mulf %5, %6 : vector<16x128xf32>
    %8 = math.exp %7 : vector<16x128xf32>
    %cst_5 = arith.constant 6.500000e+01 : f32
    %9 = vector.broadcast %cst_5 : f32 to vector<16x128xf32>
    %10 = arith.addf %3, %9 : vector<16x128xf32>
    %cst_6 = arith.constant -0.055555556 : f32
    %11 = vector.broadcast %cst_6 : f32 to vector<16x128xf32>
    %12 = arith.mulf %10, %11 : vector<16x128xf32>
    %13 = math.exp %12 : vector<16x128xf32>
    %cst_7 = arith.constant 6.500000e+01 : f32
    %14 = vector.broadcast %cst_7 : f32 to vector<16x128xf32>
    %15 = arith.addf %3, %14 : vector<16x128xf32>
    %cst_8 = arith.constant -1.250000e-02 : f32
    %16 = vector.broadcast %cst_8 : f32 to vector<16x128xf32>
    %17 = arith.mulf %15, %16 : vector<16x128xf32>
    %18 = math.exp %17 : vector<16x128xf32>
    %cst_9 = arith.constant 4.000000e+01 : f32
    %19 = vector.broadcast %cst_9 : f32 to vector<16x128xf32>
    %20 = arith.addf %3, %19 : vector<16x128xf32>
    %cst_10 = arith.constant 1.000000e-01 : f32
    %21 = vector.broadcast %cst_10 : f32 to vector<16x128xf32>
    %22 = arith.mulf %21, %20 : vector<16x128xf32>
    %cst_11 = arith.constant 0.606530666 : f32
    %23 = vector.broadcast %cst_11 : f32 to vector<16x128xf32>
    %24 = arith.mulf %8, %23 : vector<16x128xf32>
    %cst_12 = arith.constant 1.000000e+00 : f32
    %25 = vector.broadcast %cst_12 : f32 to vector<16x128xf32>
    %26 = arith.subf %25, %24 : vector<16x128xf32>
    %27 = tpu.reciprocal %26 {approx = true} : vector<16x128xf32> -> vector<16x128xf32>
    %28 = arith.mulf %22, %27 : vector<16x128xf32>
    %cst_13 = arith.constant 4.000000e+00 : f32
    %29 = vector.broadcast %cst_13 : f32 to vector<16x128xf32>
    %30 = arith.mulf %29, %13 : vector<16x128xf32>
    %cst_14 = arith.constant 0.949999988 : f32
    %31 = vector.broadcast %cst_14 : f32 to vector<16x128xf32>
    %32 = arith.mulf %28, %31 : vector<16x128xf32>
    %cst_15 = arith.constant 5.000000e-02 : f32
    %33 = vector.broadcast %cst_15 : f32 to vector<16x128xf32>
    %34 = arith.mulf %30, %33 : vector<16x128xf32>
    %35 = arith.subf %32, %34 : vector<16x128xf32>
    %cst_16 = arith.constant 1.000000e-01 : f32
    %36 = vector.broadcast %cst_16 : f32 to vector<16x128xf32>
    %37 = arith.mulf %36, %35 : vector<16x128xf32>
    %cst_17 = arith.constant 5.000000e-02 : f32
    %38 = vector.broadcast %cst_17 : f32 to vector<16x128xf32>
    %39 = arith.addf %38, %37 : vector<16x128xf32>
    %40 = arith.mulf %39, %39 : vector<16x128xf32>
    %41 = arith.mulf %40, %39 : vector<16x128xf32>
    %42 = arith.mulf %18, %18 : vector<16x128xf32>
    %43 = arith.mulf %42, %42 : vector<16x128xf32>
    %cst_18 = arith.constant 7.000000e-02 : f32
    %44 = vector.broadcast %cst_18 : f32 to vector<16x128xf32>
    %45 = arith.mulf %44, %43 : vector<16x128xf32>
    %cst_19 = arith.constant 1.000000e+00 : f32
    %46 = vector.broadcast %cst_19 : f32 to vector<16x128xf32>
    %47 = arith.addf %46, %8 : vector<16x128xf32>
    %48 = tpu.reciprocal %47 {approx = true} : vector<16x128xf32> -> vector<16x128xf32>
    %cst_20 = arith.constant 4.000000e-01 : f32
    %49 = vector.broadcast %cst_20 : f32 to vector<16x128xf32>
    %50 = arith.mulf %45, %49 : vector<16x128xf32>
    %cst_21 = arith.constant 6.000000e-01 : f32
    %51 = vector.broadcast %cst_21 : f32 to vector<16x128xf32>
    %52 = arith.mulf %48, %51 : vector<16x128xf32>
    %53 = arith.subf %50, %52 : vector<16x128xf32>
    %cst_22 = arith.constant 1.000000e-01 : f32
    %54 = vector.broadcast %cst_22 : f32 to vector<16x128xf32>
    %55 = arith.mulf %54, %53 : vector<16x128xf32>
    %cst_23 = arith.constant 6.000000e-01 : f32
    %56 = vector.broadcast %cst_23 : f32 to vector<16x128xf32>
    %57 = arith.addf %56, %55 : vector<16x128xf32>
    %cst_24 = arith.constant 1.200000e+02 : f32
    %58 = vector.broadcast %cst_24 : f32 to vector<16x128xf32>
    %59 = arith.mulf %58, %41 : vector<16x128xf32>
    %60 = arith.mulf %59, %57 : vector<16x128xf32>
    %cst_25 = arith.constant 5.000000e+01 : f32
    %61 = vector.broadcast %cst_25 : f32 to vector<16x128xf32>
    %62 = arith.subf %3, %61 : vector<16x128xf32>
    %63 = arith.mulf %60, %62 : vector<16x128xf32>
    %cst_26 = arith.constant 5.500000e+01 : f32
    %64 = vector.broadcast %cst_26 : f32 to vector<16x128xf32>
    %65 = arith.addf %3, %64 : vector<16x128xf32>
    %cst_27 = arith.constant 0.00999999977 : f32
    %66 = vector.broadcast %cst_27 : f32 to vector<16x128xf32>
    %67 = arith.mulf %66, %65 : vector<16x128xf32>
    %cst_28 = arith.constant 0.135335281 : f32
    %68 = vector.broadcast %cst_28 : f32 to vector<16x128xf32>
    %69 = arith.mulf %8, %68 : vector<16x128xf32>
    %cst_29 = arith.constant 1.000000e+00 : f32
    %70 = vector.broadcast %cst_29 : f32 to vector<16x128xf32>
    %71 = arith.subf %70, %69 : vector<16x128xf32>
    %72 = tpu.reciprocal %71 {approx = true} : vector<16x128xf32> -> vector<16x128xf32>
    %73 = arith.mulf %67, %72 : vector<16x128xf32>
    %cst_30 = arith.constant 1.250000e-01 : f32
    %74 = vector.broadcast %cst_30 : f32 to vector<16x128xf32>
    %75 = arith.mulf %74, %18 : vector<16x128xf32>
    %cst_31 = arith.constant 6.800000e-01 : f32
    %76 = vector.broadcast %cst_31 : f32 to vector<16x128xf32>
    %77 = arith.mulf %73, %76 : vector<16x128xf32>
    %cst_32 = arith.constant 3.200000e-01 : f32
    %78 = vector.broadcast %cst_32 : f32 to vector<16x128xf32>
    %79 = arith.mulf %75, %78 : vector<16x128xf32>
    %80 = arith.subf %77, %79 : vector<16x128xf32>
    %cst_33 = arith.constant 1.000000e-01 : f32
    %81 = vector.broadcast %cst_33 : f32 to vector<16x128xf32>
    %82 = arith.mulf %81, %80 : vector<16x128xf32>
    %cst_34 = arith.constant 3.200000e-01 : f32
    %83 = vector.broadcast %cst_34 : f32 to vector<16x128xf32>
    %84 = arith.addf %83, %82 : vector<16x128xf32>
    %85 = arith.mulf %84, %84 : vector<16x128xf32>
    %86 = arith.mulf %85, %85 : vector<16x128xf32>
    %cst_35 = arith.constant 3.600000e+01 : f32
    %87 = vector.broadcast %cst_35 : f32 to vector<16x128xf32>
    %88 = arith.mulf %87, %86 : vector<16x128xf32>
    %cst_36 = arith.constant -7.700000e+01 : f32
    %89 = vector.broadcast %cst_36 : f32 to vector<16x128xf32>
    %90 = arith.subf %3, %89 : vector<16x128xf32>
    %91 = arith.mulf %88, %90 : vector<16x128xf32>
    %cst_37 = arith.constant -5.440000e+01 : f32
    %92 = vector.broadcast %cst_37 : f32 to vector<16x128xf32>
    %93 = arith.subf %3, %92 : vector<16x128xf32>
    %cst_38 = arith.constant 3.000000e-01 : f32
    %94 = vector.broadcast %cst_38 : f32 to vector<16x128xf32>
    %95 = arith.mulf %94, %93 : vector<16x128xf32>
    %96 = arith.addf %63, %91 : vector<16x128xf32>
    %97 = arith.addf %96, %95 : vector<16x128xf32>
    %98 = arith.addf %97, %3 : vector<16x128xf32>
    %cst_39 = arith.constant 0.013475894 : f32
    %99 = vector.broadcast %cst_39 : f32 to vector<16x128xf32>
    %100 = arith.addf %99, %98 : vector<16x128xf32>
    %cst_40 = arith.constant 5.000000e-03 : f32
    %101 = vector.broadcast %cst_40 : f32 to vector<16x128xf32>
    %102 = arith.mulf %100, %101 : vector<16x128xf32>
    %cst_41 = arith.constant -6.500000e+01 : f32
    %103 = vector.broadcast %cst_41 : f32 to vector<16x128xf32>
    %104 = arith.addf %103, %102 : vector<16x128xf32>
    %cst_42 = arith.constant -5.000000e+01 : f32
    %105 = vector.broadcast %cst_42 : f32 to vector<16x128xf32>
    %106 = arith.cmpf oge, %104, %105 : vector<16x128xf32>
    %107 = arith.extui %106 : vector<16x128xi1> to vector<16x128xi32>
    %108 = arith.sitofp %107 : vector<16x128xi32> to vector<16x128xf32>
    %cst_43 = arith.constant 5.000000e-01 : f32
    %109 = vector.broadcast %cst_43 : f32 to vector<16x128xf32>
    %110 = arith.mulf %109, %102 : vector<16x128xf32>
    %cst_44 = arith.constant 1.000000e-01 : f32
    %111 = vector.broadcast %cst_44 : f32 to vector<16x128xf32>
    %112 = arith.mulf %111, %108 : vector<16x128xf32>
    %113 = arith.addf %110, %112 : vector<16x128xf32>
    %cst_45 = arith.constant 1.000000e-03 : f32
    %114 = vector.broadcast %cst_45 : f32 to vector<16x128xf32>
    %115 = arith.mulf %113, %114 : vector<16x128xf32>
    %cst_46 = arith.constant 5.000000e-01 : f32
    %116 = vector.broadcast %cst_46 : f32 to vector<16x128xf32>
    %117 = arith.cmpf ogt, %108, %116 : vector<16x128xf32>
    %cst_47 = arith.constant -6.500000e+01 : f32
    %118 = vector.broadcast %cst_47 : f32 to vector<16x128xf32>
    %119 = arith.select %117, %118, %104 : vector<16x128xi1>, vector<16x128xf32>
    %120 = arith.truncf %108 : vector<16x128xf32> to vector<16x128xbf16>
    %c0_48 = arith.constant 0 : index
    %c0_49 = arith.constant 0 : index
    %121 = vector.load %arg3[%c0_48, %c0_49] : memref<16x128xbf16, #tpu.memory_space<vmem>>, vector<16x128xbf16>
    tpu.vector_store %arg3[%c0_48, %c0_49], %120 {strides = array<i32>} : memref<16x128xbf16, #tpu.memory_space<vmem>>, vector<16x128xbf16>,
    %c0_50 = arith.constant 0 : index
    %c0_51 = arith.constant 0 : index
    %122 = vector.load %arg4[%c0_50, %c0_51] : memref<16x128xf32, #tpu.memory_space<vmem>>, vector<16x128xf32>
    tpu.vector_store %arg4[%c0_50, %c0_51], %119 {strides = array<i32>} : memref<16x128xf32, #tpu.memory_space<vmem>>, vector<16x128xf32>,
    %c0_52 = arith.constant 0 : index
    %c0_53 = arith.constant 0 : index
    %123 = vector.load %arg5[%c0_52, %c0_53] : memref<16x128xf32, #tpu.memory_space<vmem>>, vector<16x128xf32>
    tpu.vector_store %arg5[%c0_52, %c0_53], %115 {strides = array<i32>} : memref<16x128xf32, #tpu.memory_space<vmem>>, vector<16x128xf32>,
    return
  }
  func.func @transform_0(%arg0: i32) -> (i32, i32) {
    %c0_i32 = arith.constant 0 : i32
    %c0_i32_0 = arith.constant 0 : i32
    return %arg0, %c0_i32 : i32, i32
  }
  func.func @transform_1(%arg0: i32) -> (i32, i32) {
    %c0_i32 = arith.constant 0 : i32
    %c0_i32_0 = arith.constant 0 : i32
    %c0_i32_1 = arith.constant 0 : i32
    return %c0_i32, %c0_i32_0 : i32, i32
  }
  func.func @transform_2(%arg0: i32) -> (i32, i32) {
    %c0_i32 = arith.constant 0 : i32
    %c0_i32_0 = arith.constant 0 : i32
    return %arg0, %c0_i32 : i32, i32
  }
  func.func @transform_3(%arg0: i32) -> (i32, i32) {
    %c0_i32 = arith.constant 0 : i32
    %c0_i32_0 = arith.constant 0 : i32
    return %arg0, %c0_i32 : i32, i32
  }
  func.func @transform_4(%arg0: i32) -> (i32, i32) {
    %c0_i32 = arith.constant 0 : i32
    %c0_i32_0 = arith.constant 0 : i32
    return %arg0, %c0_i32 : i32, i32
  }
}

module attributes {stable_mosaic.version = 11 : i64} {
  func.func @_bio_snn_kernel(%arg0: i32, %arg1: memref<16x32xf32, #tpu.memory_space<vmem>>, %arg2: memref<32x128xbf16, #tpu.memory_space<vmem>>, %arg3: memref<16x128xbf16, #tpu.memory_space<vmem>>, %arg4: memref<16x128xf32, #tpu.memory_space<vmem>>, %arg5: memref<16x128xf32, #tpu.memory_space<vmem>>) attributes {dimension_semantics = [#tpu.dimension_semantics<parallel>], iteration_bounds = array<i64: 1>, scalar_prefetch = 0 : i64, scratch_operands = 0 : i64, tpu.core_type = #tpu.core_type<tc>, window_params = [{transform_indices = @transform_0, window_bounds = array<i64: 16, 32>}, {pipeline_mode = #tpu.pipeline_mode<synchronous>, transform_indices = @transform_1, window_bounds = array<i64: 32, 128>}, {transform_indices = @transform_2, window_bounds = array<i64: 16, 128>}, {transform_indices = @transform_3, window_bounds = array<i64: 16, 128>}, {transform_indices = @transform_4, window_bounds = array<i64: 16, 128>}]} {
    %c0 = arith.constant 0 : index
    %c0_0 = arith.constant 0 : index
    %0 = vector.load %arg1[%c0, %c0_0] : memref<16x32xf32, #tpu.memory_space<vmem>>, vector<16x32xf32>
    %1 = arith.truncf %0 : vector<16x32xf32> to vector<16x32xbf16>
    %c0_1 = arith.constant 0 : index
    %c0_2 = arith.constant 0 : index
    %2 = vector.load %arg2[%c0_1, %c0_2] : memref<32x128xbf16, #tpu.memory_space<vmem>>, vector<32x128xbf16>
    %cst = arith.constant dense<0.000000e+00> : vector<16x128xf32>
    %3 = tpu.matmul %1, %2, %cst {dimension_numbers = #tpu.dot_dimension_numbers<[1], [0], [0], [1], [0, 0, 1, 1], [], []>} : vector<16x32xbf16>, vector<32x128xbf16>, vector<16x128xf32> -> vector<16x128xf32>
    %cst_3 = arith.constant 3.500000e+01 : f32
    %4 = vector.broadcast %cst_3 : f32 to vector<16x128xf32>
    %5 = arith.addf %3, %4 : vector<16x128xf32>
    %cst_4 = arith.constant -1.000000e-01 : f32
    %6 = vector.broadcast %cst_4 : f32 to vector<16x128xf32>
    %7 = arith.mulf %5, %6 : vector<16x128xf32>
    %8 = math.exp %7 : vector<16x128xf32>
    %cst_5 = arith.constant 6.500000e+01 : f32
    %9 = vector.broadcast %cst_5 : f32 to vector<16x128xf32>
    %10 = arith.addf %3, %9 : vector<16x128xf32>
    %cst_6 = arith.constant -0.055555556 : f32
    %11 = vector.broadcast %cst_6 : f32 to vector<16x128xf32>
    %12 = arith.mulf %10, %11 : vector<16x128xf32>
    %13 = math.exp %12 : vector<16x128xf32>
    %cst_7 = arith.constant 6.500000e+01 : f32
    %14 = vector.broadcast %cst_7 : f32 to vector<16x128xf32>
    %15 = arith.addf %3, %14 : vector<16x128xf32>
    %cst_8 = arith.constant -1.250000e-02 : f32
    %16 = vector.broadcast %cst_8 : f32 to vector<16x128xf32>
    %17 = arith.mulf %15, %16 : vector<16x128xf32>
    %18 = math.exp %17 : vector<16x128xf32>
    %cst_9 = arith.constant 4.000000e+01 : f32
    %19 = vector.broadcast %cst_9 : f32 to vector<16x128xf32>
    %20 = arith.addf %3, %19 : vector<16x128xf32>
    %cst_10 = arith.constant 1.000000e-01 : f32
    %21 = vector.broadcast %cst_10 : f32 to vector<16x128xf32>
    %22 = arith.mulf %21, %20 : vector<16x128xf32>
    %cst_11 = arith.constant 0.606530666 : f32
    %23 = vector.broadcast %cst_11 : f32 to vector<16x128xf32>
    %24 = arith.mulf %8, %23 : vector<16x128xf32>
    %cst_12 = arith.constant 1.000000e+00 : f32
    %25 = vector.broadcast %cst_12 : f32 to vector<16x128xf32>
    %26 = arith.subf %25, %24 : vector<16x128xf32>
    %27 = tpu.reciprocal %26 {approx = true} : vector<16x128xf32> -> vector<16x128xf32>
    %28 = arith.mulf %22, %27 : vector<16x128xf32>
    %cst_13 = arith.constant 4.000000e+00 : f32
    %29 = vector.broadcast %cst_13 : f32 to vector<16x128xf32>
    %30 = arith.mulf %29, %13 : vector<16x128xf32>
    %cst_14 = arith.constant 0.949999988 : f32
    %31 = vector.broadcast %cst_14 : f32 to vector<16x128xf32>
    %32 = arith.mulf %28, %31 : vector<16x128xf32>
    %cst_15 = arith.constant 5.000000e-02 : f32
    %33 = vector.broadcast %cst_15 : f32 to vector<16x128xf32>
    %34 = arith.mulf %30, %33 : vector<16x128xf32>
    %35 = arith.subf %32, %34 : vector<16x128xf32>
    %cst_16 = arith.constant 1.000000e-01 : f32
    %36 = vector.broadcast %cst_16 : f32 to vector<16x128xf32>
    %37 = arith.mulf %36, %35 : vector<16x128xf32>
    %cst_17 = arith.constant 5.000000e-02 : f32
    %38 = vector.broadcast %cst_17 : f32 to vector<16x128xf32>
    %39 = arith.addf %38, %37 : vector<16x128xf32>
    %40 = arith.mulf %39, %39 : vector<16x128xf32>
    %41 = arith.mulf %40, %39 : vector<16x128xf32>
    %42 = arith.mulf %18, %18 : vector<16x128xf32>
    %43 = arith.mulf %42, %42 : vector<16x128xf32>
    %cst_18 = arith.constant 7.000000e-02 : f32
    %44 = vector.broadcast %cst_18 : f32 to vector<16x128xf32>
    %45 = arith.mulf %44, %43 : vector<16x128xf32>
    %cst_19 = arith.constant 1.000000e+00 : f32
    %46 = vector.broadcast %cst_19 : f32 to vector<16x128xf32>
    %47 = arith.addf %46, %8 : vector<16x128xf32>
    %48 = tpu.reciprocal %47 {approx = true} : vector<16x128xf32> -> vector<16x128xf32>
    %cst_20 = arith.constant 4.000000e-01 : f32
    %49 = vector.broadcast %cst_20 : f32 to vector<16x128xf32>
    %50 = arith.mulf %45, %49 : vector<16x128xf32>
    %cst_21 = arith.constant 6.000000e-01 : f32
    %51 = vector.broadcast %cst_21 : f32 to vector<16x128xf32>
    %52 = arith.mulf %48, %51 : vector<16x128xf32>
    %53 = arith.subf %50, %52 : vector<16x128xf32>
    %cst_22 = arith.constant 1.000000e-01 : f32
    %54 = vector.broadcast %cst_22 : f32 to vector<16x128xf32>
    %55 = arith.mulf %54, %53 : vector<16x128xf32>
    %cst_23 = arith.constant 6.000000e-01 : f32
    %56 = vector.broadcast %cst_23 : f32 to vector<16x128xf32>
    %57 = arith.addf %56, %55 : vector<16x128xf32>
    %cst_24 = arith.constant 1.200000e+02 : f32
    %58 = vector.broadcast %cst_24 : f32 to vector<16x128xf32>
    %59 = arith.mulf %58, %41 : vector<16x128xf32>
    %60 = arith.mulf %59, %57 : vector<16x128xf32>
    %cst_25 = arith.constant 5.000000e+01 : f32
    %61 = vector.broadcast %cst_25 : f32 to vector<16x128xf32>
    %62 = arith.subf %3, %61 : vector<16x128xf32>
    %63 = arith.mulf %60, %62 : vector<16x128xf32>
    %cst_26 = arith.constant 5.500000e+01 : f32
    %64 = vector.broadcast %cst_26 : f32 to vector<16x128xf32>
    %65 = arith.addf %3, %64 : vector<16x128xf32>
    %cst_27 = arith.constant 0.00999999977 : f32
    %66 = vector.broadcast %cst_27 : f32 to vector<16x128xf32>
    %67 = arith.mulf %66, %65 : vector<16x128xf32>
    %cst_28 = arith.constant 0.135335281 : f32
    %68 = vector.broadcast %cst_28 : f32 to vector<16x128xf32>
    %69 = arith.mulf %8, %68 : vector<16x128xf32>
    %cst_29 = arith.constant 1.000000e+00 : f32
    %70 = vector.broadcast %cst_29 : f32 to vector<16x128xf32>
    %71 = arith.subf %70, %69 : vector<16x128xf32>
    %72 = tpu.reciprocal %71 {approx = true} : vector<16x128xf32> -> vector<16x128xf32>
    %73 = arith.mulf %67, %72 : vector<16x128xf32>
    %cst_30 = arith.constant 1.250000e-01 : f32
    %74 = vector.broadcast %cst_30 : f32 to vector<16x128xf32>
    %75 = arith.mulf %74, %18 : vector<16x128xf32>
    %cst_31 = arith.constant 6.800000e-01 : f32
    %76 = vector.broadcast %cst_31 : f32 to vector<16x128xf32>
    %77 = arith.mulf %73, %76 : vector<16x128xf32>
    %cst_32 = arith.constant 3.200000e-01 : f32
    %78 = vector.broadcast %cst_32 : f32 to vector<16x128xf32>
    %79 = arith.mulf %75, %78 : vector<16x128xf32>
    %80 = arith.subf %77, %79 : vector<16x128xf32>
    %cst_33 = arith.constant 1.000000e-01 : f32
    %81 = vector.broadcast %cst_33 : f32 to vector<16x128xf32>
    %82 = arith.mulf %81, %80 : vector<16x128xf32>
    %cst_34 = arith.constant 3.200000e-01 : f32
    %83 = vector.broadcast %cst_34 : f32 to vector<16x128xf32>
    %84 = arith.addf %83, %82 : vector<16x128xf32>
    %85 = arith.mulf %84, %84 : vector<16x128xf32>
    %86 = arith.mulf %85, %85 : vector<16x128xf32>
    %cst_35 = arith.constant 3.600000e+01 : f32
    %87 = vector.broadcast %cst_35 : f32 to vector<16x128xf32>
    %88 = arith.mulf %87, %86 : vector<16x128xf32>
    %cst_36 = arith.constant -7.700000e+01 : f32
    %89 = vector.broadcast %cst_36 : f32 to vector<16x128xf32>
    %90 = arith.subf %3, %89 : vector<16x128xf32>
    %91 = arith.mulf %88, %90 : vector<16x128xf32>
    %cst_37 = arith.constant -5.440000e+01 : f32
    %92 = vector.broadcast %cst_37 : f32 to vector<16x128xf32>
    %93 = arith.subf %3, %92 : vector<16x128xf32>
    %cst_38 = arith.constant 3.000000e-01 : f32
    %94 = vector.broadcast %cst_38 : f32 to vector<16x128xf32>
    %95 = arith.mulf %94, %93 : vector<16x128xf32>
    %96 = arith.addf %63, %91 : vector<16x128xf32>
    %97 = arith.addf %96, %95 : vector<16x128xf32>
    %98 = arith.addf %97, %3 : vector<16x128xf32>
    %cst_39 = arith.constant 0.013475894 : f32
    %99 = vector.broadcast %cst_39 : f32 to vector<16x128xf32>
    %100 = arith.addf %99, %98 : vector<16x128xf32>
    %cst_40 = arith.constant 5.000000e-03 : f32
    %101 = vector.broadcast %cst_40 : f32 to vector<16x128xf32>
    %102 = arith.mulf %100, %101 : vector<16x128xf32>
    %cst_41 = arith.constant -6.500000e+01 : f32
    %103 = vector.broadcast %cst_41 : f32 to vector<16x128xf32>
    %104 = arith.addf %103, %102 : vector<16x128xf32>
    %cst_42 = arith.constant -5.000000e+01 : f32
    %105 = vector.broadcast %cst_42 : f32 to vector<16x128xf32>
    %106 = arith.cmpf oge, %104, %105 : vector<16x128xf32>
    %107 = arith.extui %106 : vector<16x128xi1> to vector<16x128xi32>
    %108 = arith.sitofp %107 : vector<16x128xi32> to vector<16x128xf32>
    %cst_43 = arith.constant 5.000000e-01 : f32
    %109 = vector.broadcast %cst_43 : f32 to vector<16x128xf32>
    %110 = arith.mulf %109, %102 : vector<16x128xf32>
    %cst_44 = arith.constant 1.000000e-01 : f32
    %111 = vector.broadcast %cst_44 : f32 to vector<16x128xf32>
    %112 = arith.mulf %111, %108 : vector<16x128xf32>
    %113 = arith.addf %110, %112 : vector<16x128xf32>
    %cst_45 = arith.constant 1.000000e-03 : f32
    %114 = vector.broadcast %cst_45 : f32 to vector<16x128xf32>
    %115 = arith.mulf %113, %114 : vector<16x128xf32>
    %cst_46 = arith.constant 5.000000e-01 : f32
    %116 = vector.broadcast %cst_46 : f32 to vector<16x128xf32>
    %117 = arith.cmpf ogt, %108, %116 : vector<16x128xf32>
    %cst_47 = arith.constant -6.500000e+01 : f32
    %118 = vector.broadcast %cst_47 : f32 to vector<16x128xf32>
    %119 = arith.select %117, %118, %104 : vector<16x128xi1>, vector<16x128xf32>
    %120 = arith.truncf %108 : vector<16x128xf32> to vector<16x128xbf16>
    %c0_48 = arith.constant 0 : index
    %c0_49 = arith.constant 0 : index
    %121 = vector.load %arg3[%c0_48, %c0_49] : memref<16x128xbf16, #tpu.memory_space<vmem>>, vector<16x128xbf16>
    tpu.vector_store %arg3[%c0_48, %c0_49], %120 {strides = array<i32>} : memref<16x128xbf16, #tpu.memory_space<vmem>>, vector<16x128xbf16>,
    %c0_50 = arith.constant 0 : index
    %c0_51 = arith.constant 0 : index
    %122 = vector.load %arg4[%c0_50, %c0_51] : memref<16x128xf32, #tpu.memory_space<vmem>>, vector<16x128xf32>
    tpu.vector_store %arg4[%c0_50, %c0_51], %119 {strides = array<i32>} : memref<16x128xf32, #tpu.memory_space<vmem>>, vector<16x128xf32>,
    %c0_52 = arith.constant 0 : index
    %c0_53 = arith.constant 0 : index
    %123 = vector.load %arg5[%c0_52, %c0_53] : memref<16x128xf32, #tpu.memory_space<vmem>>, vector<16x128xf32>
    tpu.vector_store %arg5[%c0_52, %c0_53], %115 {strides = array<i32>} : memref<16x128xf32, #tpu.memory_space<vmem>>, vector<16x128xf32>,
    return
  }
  func.func @transform_0(%arg0: i32) -> (i32, i32) {
    %c0_i32 = arith.constant 0 : i32
    %c0_i32_0 = arith.constant 0 : i32
    return %arg0, %c0_i32 : i32, i32
  }
  func.func @transform_1(%arg0: i32) -> (i32, i32) {
    %c0_i32 = arith.constant 0 : i32
    %c0_i32_0 = arith.constant 0 : i32
    %c0_i32_1 = arith.constant 0 : i32
    return %c0_i32, %c0_i32_0 : i32, i32
  }
  func.func @transform_2(%arg0: i32) -> (i32, i32) {
    %c0_i32 = arith.constant 0 : i32
    %c0_i32_0 = arith.constant 0 : i32
    return %arg0, %c0_i32 : i32, i32
  }
  func.func @transform_3(%arg0: i32) -> (i32, i32) {
    %c0_i32 = arith.constant 0 : i32
    %c0_i32_0 = arith.constant 0 : i32
    return %arg0, %c0_i32 : i32, i32
  }
  func.func @transform_4(%arg0: i32) -> (i32, i32) {
    %c0_i32 = arith.constant 0 : i32
    %c0_i32_0 = arith.constant 0 : i32
    return %arg0, %c0_i32 : i32, i32
  }
}

</mosaic_0001>

<bundles_post_ra>
// kernel: tpu_custom_call.1
= control target key start
LH: loop header
LB: loop body
LE: loop exit
PB: predicated region body
PF: predicated region fallthrough
CT: control target
= control target key end

     0   :  { %10 = vsyncpa [#allocation3], 0  ;;  %s590_s0 = inlined_call_operand.hbm [shape: f32[16,32], index: 0, kind: input, shape index: {}]   ;;  %s591_s1 = inlined_call_operand.hbm [shape: bf16[32,128], index: 1, kind: input, shape index: {}]   ;;  %s592_s2 = inlined_call_operand.hbm [shape: bf16[16,128], index: 2, kind: output, shape index: {0}]   ;;  %s593_s3 = inlined_call_operand.hbm [shape: f32[16,128], index: 3, kind: output, shape index: {1}]   ;;  %s594_s4 = inlined_call_operand.hbm [shape: f32[16,128], index: 4, kind: output, shape index: {2}]  }
   0x1   :  { %11 = vsyncpa [#allocation6], 0 }
   0x2   :  { %12 = vsyncpa [#allocation4], 0 }
   0x3   :  { %13 = vsyncpa [#allocation9], 0  ;;  %s492_s15 = smov [#allocation2]  }
   0x4   :  { %s19_s16 = sshll.u32 %s492_s15, 4  ;;  %s20_s16 = int_to_ptr.vmem [resolvable:$true] %s19_s16 }
   0x5   :  { %s392_s17 = scalar_lea.vmem %s20_s16, 256  ;;  %p397_p1 = scmp.lt.s32.totalorder %s20_s16, %s20_s16 }
   0x6   :  { %p393_p0 = scmp.ne.s32.totalorder %s20_s16, %s392_s17  ;;  %p398_p2 = scmp.lt.s32.totalorder %s392_s17, %s392_s17 }
   0x8   :  { %p399_p3 = por %p398_p2, %p397_p1 }
   0xa   :  { %p400_p4 = pnand %p399_p3, %p393_p0 }
   0xc   :  { %403 = shalt.err (!%p400_p4)
}
   0xd   :  { %s493_s18 = smov 128   ;;  %s494_s19 = smov 8  }
   0xe   :  { %25 = dma.hbm_to_vmem [thread:$0]  %s590_s0, 256, %s20_s16, [#allocation3], %s493_s18, %s493_s18, %s494_s19  }
   0xf   :  { %s495_s22 = smov [#allocation5]  }
  0x10   :  { %s31_s23 = sshll.u32 %s495_s22, 4  ;;  %s32_s23 = int_to_ptr.vmem [resolvable:$true] %s31_s23 }
  0x11   :  { %s412_s24 = scalar_lea.vmem %s32_s23, 256  ;;  %p417_p6 = scmp.lt.s32.totalorder %s32_s23, %s32_s23 }
  0x12   :  { %p413_p5 = scmp.ne.s32.totalorder %s32_s23, %s412_s24  ;;  %p418_p7 = scmp.lt.s32.totalorder %s412_s24, %s412_s24 }
  0x14   :  { %p419_p8 = por %p418_p7, %p417_p6 }
  0x16   :  { %p420_p9 = pnand %p419_p8, %p413_p5 }
  0x18   :  { %423 = shalt.err (!%p420_p9)
}
  0x19   :  { %s496_s25 = smov 64   ;;  %s497_s26 = smov 4  }
  0x1a   :  { %37 = dma.hbm_to_vmem [thread:$0]  %s591_s1, 256, %s32_s23, [#allocation6], %s496_s25, %s496_s25, %s497_s26  }
  0x1b   :  { %484 = dma.done.wait [#allocation3], 256  }
  0x1c   :  { %485 = vsyncadd [#allocation3], 4294967040 }
  0x1d   :  { %486 = dma.done.wait [#allocation6], 256  }
  0x1e   :  { %487 = vsyncadd [#allocation6], 4294967040  ;;  %v498_v0 = vmov 0.0   ;;  %vm499_vm0 = vmmov 0   ;;  %v358_v1 = vld [vmem:[#allocation5 + $0x8] sm:$0xff]   ;;  %v359_v2 = vld [vmem:[#allocation5] sm:$0xff]  }
  0x1f   :  { %339 = vmatprep.subr.bf16.mxu0 %v498_v0  ;;  %343 = vmatprep.mubr.msk.bf16.mxu0 %vm499_vm0, %v498_v0  ;;  %v45_v3 = vld [vmem:[#allocation2] sm:$0xff]  ;;  %v46_v4 = vld [vmem:[#allocation2 + $0x8] sm:$0xff]  ;;  %vm64_vm1 = vcmask 261120   ;;  %s500_s0 = smov [#allocation8]   ;;  %s501_s29 = smov [#allocation7]  }
  0x20   :  { %340 = vmatpush3.bf16.msra.mxu0 %v358_v1  ;;  %v47_v5 = vpack.c.bf16 %v46_v4, %v45_v3  ;;  %s286_s1 = sshll.u32 %s500_s0, 4  ;;  %s274_s30 = sshll.u32 %s501_s29, 4  ;;  %s287_s1 = int_to_ptr.vmem [resolvable:$true] %s286_s1  ;;  %s275_s30 = int_to_ptr.vmem [resolvable:$true] %s274_s30 }
  0x21   :  { %341 = vmatprep.subr.bf16.mxu0 %v498_v0  ;;  %s502_s5 = smov [#allocation10]   ;;  %s424_s7 = scalar_lea.vmem %s287_s1, 256 }
  0x22   :  { %s298_s6 = sshll.u32 %s502_s5, 4  ;;  %p425_p10 = scmp.ne.s32.totalorder %s287_s1, %s424_s7  ;;  %s565_s6 = int_to_ptr.vmem [resolvable:$true] %s298_s6 }
  0x23   :  { %p429_p11 = scmp.lt.s32.totalorder %s287_s1, %s287_s1  ;;  %p430_p12 = scmp.lt.s32.totalorder %s424_s7, %s424_s7 }
  0x24   :  { %342 = vmatpush3.bf16.msra.mxu0 %v359_v2 }
  0x25   :  { %p431_p13 = por %p430_p12, %p429_p11 }
  0x27   :  { %344 = vmatmul.mubr.msk.bf16.vlgmr.msra.gmra.mxu0 %vm64_vm1, %v47_v5  ;;  %p432_p0 = pnand %p431_p13, %p425_p10 }
  0xe7   :  { %v543_v6 = vpop.f32.mrf.mxu0 }
  0xe8   :  { %v109_v7 = vadd.f32 35.0, %v543_v6  ;;  %v117_v10 = vadd.f32 65.0, %v543_v6  ;;  %v131_v42 = vadd.f32 40.0, %v543_v6  ;;  %v187_v43 = vadd.f32 55.0, %v543_v6 }
  0xe9   :  { %v345_v8 = vpop.f32.mrf.mxu0 }
  0xea   :  { %v111_v9 = vmul.f32 -0.1, %v109_v7  ;;  %v125_v15 = vmul.f32 -0.0125, %v117_v10  ;;  %v119_v19 = vmul.f32 -0.055555556, %v117_v10 }
  0xeb   :  { %v547_v11 = vpop.f32.mrf.mxu0  ;;  %v133_v49 = vmul.f32 0.1, %v131_v42  ;;  %v189_v51 = vmul.f32 0.01, %v187_v43 }
  0xec   :  { %v113_v12 = vmul.f32 1.442695, %v111_v9  ;;  %v110_v13 = vadd.f32 35.0, %v547_v11  ;;  %v118_v17 = vadd.f32 65.0, %v547_v11  ;;  %v127_v20 = vmul.f32 1.442695, %v125_v15 }
  0xed   :  { %v346_v14 = vpop.f32.mrf.mxu0  ;;  %v121_v22 = vmul.f32 1.442695, %v119_v19  ;;  %v132_v52 = vadd.f32 40.0, %v547_v11  ;;  %v188_v56 = vadd.f32 55.0, %v547_v11 }
  0xee   :  { %360 = vpow2.f32 %v113_v12  ;;  %v112_v16 = vmul.f32 -0.1, %v110_v13  ;;  %v126_v21 = vmul.f32 -0.0125, %v118_v17  ;;  %v120_v23 = vmul.f32 -0.055555556, %v118_v17 }
  0xef   :  { %v134_v2 = vmul.f32 0.1, %v132_v52  ;;  %v190_v7 = vmul.f32 0.01, %v188_v56 }
  0xf0   :  { %v115_v18 = vmul.f32 1.442695, %v112_v16  ;;  %v129_v24 = vmul.f32 1.442695, %v126_v21  ;;  %v123_v25 = vmul.f32 1.442695, %v120_v23 }
  0xf2   :  { %362 = vpow2.f32 %v115_v18 }
  0xf3   :  { %364 = vpow2.f32 %v127_v20 }
  0xf4   :  { %366 = vpow2.f32 %v121_v22 }
  0xf5   :  { %368 = vpow2.f32 %v129_v24 }
  0xf6   :  { %370 = vpow2.f32 %v123_v25 }
  0xfb   :  { %v361_v26 = vpop.eup %360 }
  0xfc   :  { %v135_v27 = vmul.f32 0.60653067, %v361_v26  ;;  %v191_v28 = vmul.f32 0.13533528, %v361_v26  ;;  %v165_v29 = vadd.f32 1.0, %v361_v26 }
  0xfe   :  { %v137_v30 = vsub.f32 1.0, %v135_v27  ;;  %v193_v31 = vsub.f32 1.0, %v191_v28  ;;  %372 = vrcp.f32 %v165_v29 }
  0xff   :  { %v363_v32 = vpop.eup %362 }
 0x100   :  { %374 = vrcp.f32 %v137_v30  ;;  %v136_v33 = vmul.f32 0.60653067, %v363_v32  ;;  %v192_v34 = vmul.f32 0.13533528, %v363_v32  ;;  %v166_v35 = vadd.f32 1.0, %v363_v32  ;;  %v365_v36 = vpop.eup %364 }
 0x101   :  { %376 = vrcp.f32 %v193_v31  ;;  %v159_v39 = vmul.f32 %v365_v36, %v365_v36  ;;  %v367_v40 = vpop.eup %366  ;;  %v199_v53 = vmul.f32 0.125, %v365_v36 }
 0x102   :  { %v138_v37 = vsub.f32 1.0, %v136_v33  ;;  %v194_v38 = vsub.f32 1.0, %v192_v34  ;;  %378 = vrcp.f32 %v166_v35  ;;  %v369_v41 = vpop.eup %368  ;;  %v143_v46 = vmul.f32 4.0, %v367_v40 }
 0x103   :  { %v161_v44 = vmul.f32 %v159_v39, %v159_v39  ;;  %v371_v45 = vpop.eup %370  ;;  %v160_v47 = vmul.f32 %v369_v41, %v369_v41  ;;  %v203_v4 = vmul.f32 0.32, %v199_v53  ;;  %v200_v10 = vmul.f32 0.125, %v369_v41 }
 0x104   :  { %380 = vrcp.f32 %v138_v37  ;;  %v147_v59 = vmul.f32 0.05, %v143_v46  ;;  %v144_v62 = vmul.f32 4.0, %v371_v45 }
 0x105   :  { %382 = vrcp.f32 %v194_v38  ;;  %v163_v57 = vmul.f32 0.07, %v161_v44  ;;  %v162_v60 = vmul.f32 %v160_v47, %v160_v47  ;;  %v204_v25 = vmul.f32 0.32, %v200_v10 }
 0x106   :  { %v148_v17 = vmul.f32 0.05, %v144_v62  ;;  %v321_v44 = vadd.f32 -50.0, %v543_v6  ;;  %v326_v62 = vadd.f32 54.4, %v547_v11 }
 0x107   :  { %v169_v9 = vmul.f32 0.4, %v163_v57  ;;  %v164_v14 = vmul.f32 0.07, %v162_v60  ;;  %v322_v60 = vadd.f32 -50.0, %v547_v11 }
 0x109   :  { %v170_v27 = vmul.f32 0.4, %v164_v14 }
 0x10b   :  { %v373_v48 = vpop.eup %372 }
 0x10c   :  { %v171_v63 = vmul.f32 0.6, %v373_v48  ;;  %v323_v48 = vadd.f32 77.0, %v543_v6 }
 0x10d   :  { %v375_v50 = vpop.eup %374 }
 0x10e   :  { %v377_v54 = vpop.eup %376  ;;  %v141_v55 = vmul.f32 %v375_v50, %v133_v49  ;;  %v173_v19 = vsub.f32 %v169_v9, %v171_v63  ;;  %v325_v49 = vadd.f32 54.4, %v543_v6 }
 0x10f   :  { %v197_v58 = vmul.f32 %v377_v54, %v189_v51  ;;  %v379_v1 = vpop.eup %378 }
 0x110   :  { %v145_v61 = vmul.f32 0.95, %v141_v55  ;;  %v172_v21 = vmul.f32 0.6, %v379_v1  ;;  %v175_v30 = vmul.f32 0.1, %v173_v19 }
 0x111   :  { %v201_v3 = vmul.f32 0.68, %v197_v58  ;;  %v381_v5 = vpop.eup %380  ;;  %v223_v57 = vmul.f32 0.3, %v325_v49 }
 0x112   :  { %v149_v8 = vsub.f32 %v145_v61, %v147_v59  ;;  %v383_v12 = vpop.eup %382  ;;  %v142_v13 = vmul.f32 %v381_v5, %v134_v2  ;;  %v174_v33 = vsub.f32 %v170_v27, %v172_v21  ;;  %v177_v39 = vadd.f32 0.6, %v175_v30 }
 0x113   :  { %v205_v15 = vsub.f32 %v201_v3, %v203_v4  ;;  %v198_v16 = vmul.f32 %v383_v12, %v190_v7  ;;  %v324_v61 = vadd.f32 77.0, %v547_v11  ;;  %v224_v4 = vmul.f32 0.3, %v326_v62 }
 0x114   :  { %v151_v18 = vmul.f32 0.1, %v149_v8  ;;  %v146_v20 = vmul.f32 0.95, %v142_v13  ;;  %v176_v43 = vmul.f32 0.1, %v174_v33 }
 0x115   :  { %v207_v22 = vmul.f32 0.1, %v205_v15  ;;  %v202_v24 = vmul.f32 0.68, %v198_v16 }
 0x116   :  { %v153_v23 = vadd.f32 0.05, %v151_v18  ;;  %v150_v26 = vsub.f32 %v146_v20, %v148_v17  ;;  %v178_v54 = vadd.f32 0.6, %v176_v43 }
 0x117   :  { %v209_v28 = vadd.f32 0.32, %v207_v22  ;;  %v206_v31 = vsub.f32 %v202_v24, %v204_v25 }
 0x118   :  { %v155_v29 = vmul.f32 %v153_v23, %v153_v23  ;;  %v152_v32 = vmul.f32 0.1, %v150_v26 }
 0x119   :  { %v211_v34 = vmul.f32 %v209_v28, %v209_v28  ;;  %v208_v36 = vmul.f32 0.1, %v206_v31 }
 0x11a   :  { %v157_v35 = vmul.f32 %v155_v29, %v153_v23  ;;  %v154_v37 = vadd.f32 0.05, %v152_v32 }
 0x11b   :  { %v213_v38 = vmul.f32 %v211_v34, %v211_v34  ;;  %v210_v41 = vadd.f32 0.32, %v208_v36 }
 0x11c   :  { %v179_v40 = vmul.f32 120.0, %v157_v35  ;;  %v156_v42 = vmul.f32 %v154_v37, %v154_v37 }
 0x11d   :  { %v215_v45 = vmul.f32 36.0, %v213_v38  ;;  %v212_v47 = vmul.f32 %v210_v41, %v210_v41 }
 0x11e   :  { %v181_v46 = vmul.f32 %v179_v40, %v177_v39  ;;  %v158_v50 = vmul.f32 %v156_v42, %v154_v37 }
 0x11f   :  { %v214_v52 = vmul.f32 %v212_v47, %v212_v47  ;;  %v219_v53 = vmul.f32 %v323_v48, %v215_v45 }
 0x120   :  { %v185_v51 = vmul.f32 %v321_v44, %v181_v46  ;;  %v180_v55 = vmul.f32 120.0, %v158_v50 }
 0x121   :  { %v216_v56 = vmul.f32 36.0, %v214_v52 }
 0x122   :  { %v225_v58 = vadd.f32 %v219_v53, %v185_v51  ;;  %v182_v59 = vmul.f32 %v180_v55, %v178_v54 }
 0x123   :  { %v220_v2 = vmul.f32 %v324_v61, %v216_v56 }
 0x124   :  { %v227_v63 = vadd.f32 %v225_v58, %v223_v57  ;;  %v186_v1 = vmul.f32 %v322_v60, %v182_v59 }
 0x126   :  { %v229_v3 = vadd.f32 %v227_v63, %v543_v6  ;;  %v226_v5 = vadd.f32 %v220_v2, %v186_v1 }
 0x128   :  { %v231_v7 = vadd.f32 0.013475894, %v229_v3  ;;  %v228_v8 = vadd.f32 %v226_v5, %v224_v4 }
 0x12a   :  { %v233_v9 = vmul.f32 0.005, %v231_v7  ;;  %v230_v10 = vadd.f32 %v228_v8, %v547_v11 }
 0x12c   :  { %v235_v12 = vadd.f32 -65.0, %v233_v9  ;;  %v232_v13 = vadd.f32 0.013475894, %v230_v10  ;;  %v243_v17 = vmul.f32 0.5, %v233_v9 }
 0x12e   :  { %vm237_vm2 = vcmp.ge.f32.partialorder %v235_v12, -50.0  ;;  %v234_v14 = vmul.f32 0.005, %v232_v13 }
 0x12f   :  { %v327_v15 = vsel %vm237_vm2, 1.0, %v498_v0 }
 0x130   :  { %v245_v16 = vmul.f32 0.1, %v327_v15  ;;  %vm251_vm3 = vcmp.gt.f32.partialorder %v327_v15, 0.5  ;;  %v236_v18 = vadd.f32 -65.0, %v234_v14  ;;  %v244_v23 = vmul.f32 0.5, %v234_v14 }
 0x131   :  { %v253_v19 = vsel %vm251_vm3, -65.0, %v235_v12 }
 0x132   :  { %265 = vst [vmem:[#allocation8] sm:$0xff] %v253_v19  ;;  %v247_v6 = vadd.f32 %v245_v16, %v243_v17  ;;  %vm238_vm4 = vcmp.ge.f32.partialorder %v236_v18, -50.0 }
 0x133   :  { %v328_v11 = vsel %vm238_vm4, 1.0, %v498_v0 }
 0x134   :  { %v249_v20 = vmul.f32 0.001, %v247_v6  ;;  %v246_v21 = vmul.f32 0.1, %v328_v11  ;;  %vm252_vm5 = vcmp.gt.f32.partialorder %v328_v11, 0.5  ;;  %v334_v22 = vpack.c.bf16 %v328_v11, %v327_v15 }
 0x135   :  { %v254_v24 = vsel %vm252_vm5, -65.0, %v236_v18 }
 0x136   :  { %267 = vst [vmem:[#allocation10] sm:$0xff] %v249_v20  ;;  %266 = vst [vmem:[#allocation8 + $0x8] sm:$0xff] %v254_v24  ;;  %v248_v25 = vadd.f32 %v246_v21, %v244_v23 }
 0x137   :  { %335 = vst [vmem:[#allocation7] sm:$0xff] %v334_v22  }
 0x138   :  { %435 = shalt.err (!%p432_p0)
}
 0x139   :  { %292 = dma.vmem_to_hbm [thread:$0]  %s287_s1, 256, %s593_s3, [#allocation9], %s493_s18, %s493_s18, %s494_s19  }
 0x13a   :  { %s444_s10 = scalar_lea.vmem %s275_s30, 128  ;;  %p449_p2 = scmp.lt.s32.totalorder %s275_s30, %s275_s30 }
 0x13b   :  { %p445_p1 = scmp.ne.s32.totalorder %s275_s30, %s444_s10  ;;  %p450_p3 = scmp.lt.s32.totalorder %s444_s10, %s444_s10 }
 0x13d   :  { %p451_p4 = por %p450_p3, %p449_p2 }
 0x13f   :  { %p452_p5 = pnand %p451_p4, %p445_p1 }
 0x141   :  { %455 = shalt.err (!%p452_p5)
}
 0x142   :  { %280 = dma.vmem_to_hbm [thread:$0]  %s275_s30, 128, %s592_s2, [#allocation4], %s496_s25, %s496_s25, %s497_s26   ;;  %v250_v0 = vmul.f32 0.001, %v248_v25 }
 0x143   :  { %s464_s3 = scalar_lea.vmem %s565_s6, 256  ;;  %p469_p7 = scmp.lt.s32.totalorder %s565_s6, %s565_s6 }
 0x144   :  { %268 = vst [vmem:[#allocation10 + $0x8] sm:$0xff] %v250_v0  ;;  %p465_p6 = scmp.ne.s32.totalorder %s565_s6, %s464_s3  ;;  %p470_p8 = scmp.lt.s32.totalorder %s464_s3, %s464_s3 }
 0x146   :  { %p471_p9 = por %p470_p8, %p469_p7 }
 0x148   :  { %p472_p10 = pnand %p471_p9, %p465_p6 }
 0x14a   :  { %475 = shalt.err (!%p472_p10)
}
 0x14b   :  { %304 = dma.vmem_to_hbm [thread:$0]  %s565_s6, 256, %s594_s4, [#allocation9], %s493_s18, %s493_s18, %s494_s19  }
 0x14c   :  { %488 = dma.done.wait [#allocation4], 128  }
 0x14d   :  { %489 = vsyncadd [#allocation4], 4294967168 }
 0x14e   :  { %490 = dma.done.wait [#allocation9], 512  }
 0x14f   :  { %491 = vsyncadd [#allocation9], 4294966784 }
 0x150   :  { %314 = vsyncpa [#allocation3], 1 }
 0x151   :  { %315 = vsyncpa [#allocation6], 1 }
 0x152   :  { %316 = vsyncpa [#allocation4], 1 }
 0x153   :  { %317 = vsyncpa [#allocation9], 1 }

// kernel: tpu_custom_call.1
= control target key start
LH: loop header
LB: loop body
LE: loop exit
PB: predicated region body
PF: predicated region fallthrough
CT: control target
= control target key end

     0   :  { %10 = vsyncpa [#allocation3], 0  ;;  %s590_s0 = inlined_call_operand.hbm [shape: f32[16,32], index: 0, kind: input, shape index: {}]   ;;  %s591_s1 = inlined_call_operand.hbm [shape: bf16[32,128], index: 1, kind: input, shape index: {}]   ;;  %s592_s2 = inlined_call_operand.hbm [shape: bf16[16,128], index: 2, kind: output, shape index: {0}]   ;;  %s593_s3 = inlined_call_operand.hbm [shape: f32[16,128], index: 3, kind: output, shape index: {1}]   ;;  %s594_s4 = inlined_call_operand.hbm [shape: f32[16,128], index: 4, kind: output, shape index: {2}]  }
   0x1   :  { %11 = vsyncpa [#allocation6], 0 }
   0x2   :  { %12 = vsyncpa [#allocation4], 0 }
   0x3   :  { %13 = vsyncpa [#allocation9], 0  ;;  %s492_s15 = smov [#allocation2]  }
   0x4   :  { %s19_s16 = sshll.u32 %s492_s15, 4  ;;  %s20_s16 = int_to_ptr.vmem [resolvable:$true] %s19_s16 }
   0x5   :  { %s392_s17 = scalar_lea.vmem %s20_s16, 256  ;;  %p397_p1 = scmp.lt.s32.totalorder %s20_s16, %s20_s16 }
   0x6   :  { %p393_p0 = scmp.ne.s32.totalorder %s20_s16, %s392_s17  ;;  %p398_p2 = scmp.lt.s32.totalorder %s392_s17, %s392_s17 }
   0x8   :  { %p399_p3 = por %p398_p2, %p397_p1 }
   0xa   :  { %p400_p4 = pnand %p399_p3, %p393_p0 }
   0xc   :  { %403 = shalt.err (!%p400_p4)
}
   0xd   :  { %s493_s18 = smov 128   ;;  %s494_s19 = smov 8  }
   0xe   :  { %25 = dma.hbm_to_vmem [thread:$0]  %s590_s0, 256, %s20_s16, [#allocation3], %s493_s18, %s493_s18, %s494_s19  }
   0xf   :  { %s495_s22 = smov [#allocation5]  }
  0x10   :  { %s31_s23 = sshll.u32 %s495_s22, 4  ;;  %s32_s23 = int_to_ptr.vmem [resolvable:$true] %s31_s23 }
  0x11   :  { %s412_s24 = scalar_lea.vmem %s32_s23, 256  ;;  %p417_p6 = scmp.lt.s32.totalorder %s32_s23, %s32_s23 }
  0x12   :  { %p413_p5 = scmp.ne.s32.totalorder %s32_s23, %s412_s24  ;;  %p418_p7 = scmp.lt.s32.totalorder %s412_s24, %s412_s24 }
  0x14   :  { %p419_p8 = por %p418_p7, %p417_p6 }
  0x16   :  { %p420_p9 = pnand %p419_p8, %p413_p5 }
  0x18   :  { %423 = shalt.err (!%p420_p9)
}
  0x19   :  { %s496_s25 = smov 64   ;;  %s497_s26 = smov 4  }
  0x1a   :  { %37 = dma.hbm_to_vmem [thread:$0]  %s591_s1, 256, %s32_s23, [#allocation6], %s496_s25, %s496_s25, %s497_s26  }
  0x1b   :  { %484 = dma.done.wait [#allocation3], 256  }
  0x1c   :  { %485 = vsyncadd [#allocation3], 4294967040 }
  0x1d   :  { %486 = dma.done.wait [#allocation6], 256  }
  0x1e   :  { %487 = vsyncadd [#allocation6], 4294967040  ;;  %v498_v0 = vmov 0.0   ;;  %vm499_vm0 = vmmov 0   ;;  %v358_v1 = vld [vmem:[#allocation5 + $0x8] sm:$0xff]   ;;  %v359_v2 = vld [vmem:[#allocation5] sm:$0xff]  }
  0x1f   :  { %339 = vmatprep.subr.bf16.mxu0 %v498_v0  ;;  %343 = vmatprep.mubr.msk.bf16.mxu0 %vm499_vm0, %v498_v0  ;;  %v45_v3 = vld [vmem:[#allocation2] sm:$0xff]  ;;  %v46_v4 = vld [vmem:[#allocation2 + $0x8] sm:$0xff]  ;;  %vm64_vm1 = vcmask 261120   ;;  %s500_s0 = smov [#allocation8]   ;;  %s501_s29 = smov [#allocation7]  }
  0x20   :  { %340 = vmatpush3.bf16.msra.mxu0 %v358_v1  ;;  %v47_v5 = vpack.c.bf16 %v46_v4, %v45_v3  ;;  %s286_s1 = sshll.u32 %s500_s0, 4  ;;  %s274_s30 = sshll.u32 %s501_s29, 4  ;;  %s287_s1 = int_to_ptr.vmem [resolvable:$true] %s286_s1  ;;  %s275_s30 = int_to_ptr.vmem [resolvable:$true] %s274_s30 }
  0x21   :  { %341 = vmatprep.subr.bf16.mxu0 %v498_v0  ;;  %s502_s5 = smov [#allocation10]   ;;  %s424_s7 = scalar_lea.vmem %s287_s1, 256 }
  0x22   :  { %s298_s6 = sshll.u32 %s502_s5, 4  ;;  %p425_p10 = scmp.ne.s32.totalorder %s287_s1, %s424_s7  ;;  %s565_s6 = int_to_ptr.vmem [resolvable:$true] %s298_s6 }
  0x23   :  { %p429_p11 = scmp.lt.s32.totalorder %s287_s1, %s287_s1  ;;  %p430_p12 = scmp.lt.s32.totalorder %s424_s7, %s424_s7 }
  0x24   :  { %342 = vmatpush3.bf16.msra.mxu0 %v359_v2 }
  0x25   :  { %p431_p13 = por %p430_p12, %p429_p11 }
  0x27   :  { %344 = vmatmul.mubr.msk.bf16.vlgmr.msra.gmra.mxu0 %vm64_vm1, %v47_v5  ;;  %p432_p0 = pnand %p431_p13, %p425_p10 }
  0xe7   :  { %v543_v6 = vpop.f32.mrf.mxu0 }
  0xe8   :  { %v109_v7 = vadd.f32 35.0, %v543_v6  ;;  %v117_v10 = vadd.f32 65.0, %v543_v6  ;;  %v131_v42 = vadd.f32 40.0, %v543_v6  ;;  %v187_v43 = vadd.f32 55.0, %v543_v6 }
  0xe9   :  { %v345_v8 = vpop.f32.mrf.mxu0 }
  0xea   :  { %v111_v9 = vmul.f32 -0.1, %v109_v7  ;;  %v125_v15 = vmul.f32 -0.0125, %v117_v10  ;;  %v119_v19 = vmul.f32 -0.055555556, %v117_v10 }
  0xeb   :  { %v547_v11 = vpop.f32.mrf.mxu0  ;;  %v133_v49 = vmul.f32 0.1, %v131_v42  ;;  %v189_v51 = vmul.f32 0.01, %v187_v43 }
  0xec   :  { %v113_v12 = vmul.f32 1.442695, %v111_v9  ;;  %v110_v13 = vadd.f32 35.0, %v547_v11  ;;  %v118_v17 = vadd.f32 65.0, %v547_v11  ;;  %v127_v20 = vmul.f32 1.442695, %v125_v15 }
  0xed   :  { %v346_v14 = vpop.f32.mrf.mxu0  ;;  %v121_v22 = vmul.f32 1.442695, %v119_v19  ;;  %v132_v52 = vadd.f32 40.0, %v547_v11  ;;  %v188_v56 = vadd.f32 55.0, %v547_v11 }
  0xee   :  { %360 = vpow2.f32 %v113_v12  ;;  %v112_v16 = vmul.f32 -0.1, %v110_v13  ;;  %v126_v21 = vmul.f32 -0.0125, %v118_v17  ;;  %v120_v23 = vmul.f32 -0.055555556, %v118_v17 }
  0xef   :  { %v134_v2 = vmul.f32 0.1, %v132_v52  ;;  %v190_v7 = vmul.f32 0.01, %v188_v56 }
  0xf0   :  { %v115_v18 = vmul.f32 1.442695, %v112_v16  ;;  %v129_v24 = vmul.f32 1.442695, %v126_v21  ;;  %v123_v25 = vmul.f32 1.442695, %v120_v23 }
  0xf2   :  { %362 = vpow2.f32 %v115_v18 }
  0xf3   :  { %364 = vpow2.f32 %v127_v20 }
  0xf4   :  { %366 = vpow2.f32 %v121_v22 }
  0xf5   :  { %368 = vpow2.f32 %v129_v24 }
  0xf6   :  { %370 = vpow2.f32 %v123_v25 }
  0xfb   :  { %v361_v26 = vpop.eup %360 }
  0xfc   :  { %v135_v27 = vmul.f32 0.60653067, %v361_v26  ;;  %v191_v28 = vmul.f32 0.13533528, %v361_v26  ;;  %v165_v29 = vadd.f32 1.0, %v361_v26 }
  0xfe   :  { %v137_v30 = vsub.f32 1.0, %v135_v27  ;;  %v193_v31 = vsub.f32 1.0, %v191_v28  ;;  %372 = vrcp.f32 %v165_v29 }
  0xff   :  { %v363_v32 = vpop.eup %362 }
 0x100   :  { %374 = vrcp.f32 %v137_v30  ;;  %v136_v33 = vmul.f32 0.60653067, %v363_v32  ;;  %v192_v34 = vmul.f32 0.13533528, %v363_v32  ;;  %v166_v35 = vadd.f32 1.0, %v363_v32  ;;  %v365_v36 = vpop.eup %364 }
 0x101   :  { %376 = vrcp.f32 %v193_v31  ;;  %v159_v39 = vmul.f32 %v365_v36, %v365_v36  ;;  %v367_v40 = vpop.eup %366  ;;  %v199_v53 = vmul.f32 0.125, %v365_v36 }
 0x102   :  { %v138_v37 = vsub.f32 1.0, %v136_v33  ;;  %v194_v38 = vsub.f32 1.0, %v192_v34  ;;  %378 = vrcp.f32 %v166_v35  ;;  %v369_v41 = vpop.eup %368  ;;  %v143_v46 = vmul.f32 4.0, %v367_v40 }
 0x103   :  { %v161_v44 = vmul.f32 %v159_v39, %v159_v39  ;;  %v371_v45 = vpop.eup %370  ;;  %v160_v47 = vmul.f32 %v369_v41, %v369_v41  ;;  %v203_v4 = vmul.f32 0.32, %v199_v53  ;;  %v200_v10 = vmul.f32 0.125, %v369_v41 }
 0x104   :  { %380 = vrcp.f32 %v138_v37  ;;  %v147_v59 = vmul.f32 0.05, %v143_v46  ;;  %v144_v62 = vmul.f32 4.0, %v371_v45 }
 0x105   :  { %382 = vrcp.f32 %v194_v38  ;;  %v163_v57 = vmul.f32 0.07, %v161_v44  ;;  %v162_v60 = vmul.f32 %v160_v47, %v160_v47  ;;  %v204_v25 = vmul.f32 0.32, %v200_v10 }
 0x106   :  { %v148_v17 = vmul.f32 0.05, %v144_v62  ;;  %v321_v44 = vadd.f32 -50.0, %v543_v6  ;;  %v326_v62 = vadd.f32 54.4, %v547_v11 }
 0x107   :  { %v169_v9 = vmul.f32 0.4, %v163_v57  ;;  %v164_v14 = vmul.f32 0.07, %v162_v60  ;;  %v322_v60 = vadd.f32 -50.0, %v547_v11 }
 0x109   :  { %v170_v27 = vmul.f32 0.4, %v164_v14 }
 0x10b   :  { %v373_v48 = vpop.eup %372 }
 0x10c   :  { %v171_v63 = vmul.f32 0.6, %v373_v48  ;;  %v323_v48 = vadd.f32 77.0, %v543_v6 }
 0x10d   :  { %v375_v50 = vpop.eup %374 }
 0x10e   :  { %v377_v54 = vpop.eup %376  ;;  %v141_v55 = vmul.f32 %v375_v50, %v133_v49  ;;  %v173_v19 = vsub.f32 %v169_v9, %v171_v63  ;;  %v325_v49 = vadd.f32 54.4, %v543_v6 }
 0x10f   :  { %v197_v58 = vmul.f32 %v377_v54, %v189_v51  ;;  %v379_v1 = vpop.eup %378 }
 0x110   :  { %v145_v61 = vmul.f32 0.95, %v141_v55  ;;  %v172_v21 = vmul.f32 0.6, %v379_v1  ;;  %v175_v30 = vmul.f32 0.1, %v173_v19 }
 0x111   :  { %v201_v3 = vmul.f32 0.68, %v197_v58  ;;  %v381_v5 = vpop.eup %380  ;;  %v223_v57 = vmul.f32 0.3, %v325_v49 }
 0x112   :  { %v149_v8 = vsub.f32 %v145_v61, %v147_v59  ;;  %v383_v12 = vpop.eup %382  ;;  %v142_v13 = vmul.f32 %v381_v5, %v134_v2  ;;  %v174_v33 = vsub.f32 %v170_v27, %v172_v21  ;;  %v177_v39 = vadd.f32 0.6, %v175_v30 }
 0x113   :  { %v205_v15 = vsub.f32 %v201_v3, %v203_v4  ;;  %v198_v16 = vmul.f32 %v383_v12, %v190_v7  ;;  %v324_v61 = vadd.f32 77.0, %v547_v11  ;;  %v224_v4 = vmul.f32 0.3, %v326_v62 }
 0x114   :  { %v151_v18 = vmul.f32 0.1, %v149_v8  ;;  %v146_v20 = vmul.f32 0.95, %v142_v13  ;;  %v176_v43 = vmul.f32 0.1, %v174_v33 }
 0x115   :  { %v207_v22 = vmul.f32 0.1, %v205_v15  ;;  %v202_v24 = vmul.f32 0.68, %v198_v16 }
 0x116   :  { %v153_v23 = vadd.f32 0.05, %v151_v18  ;;  %v150_v26 = vsub.f32 %v146_v20, %v148_v17  ;;  %v178_v54 = vadd.f32 0.6, %v176_v43 }
 0x117   :  { %v209_v28 = vadd.f32 0.32, %v207_v22  ;;  %v206_v31 = vsub.f32 %v202_v24, %v204_v25 }
 0x118   :  { %v155_v29 = vmul.f32 %v153_v23, %v153_v23  ;;  %v152_v32 = vmul.f32 0.1, %v150_v26 }
 0x119   :  { %v211_v34 = vmul.f32 %v209_v28, %v209_v28  ;;  %v208_v36 = vmul.f32 0.1, %v206_v31 }
 0x11a   :  { %v157_v35 = vmul.f32 %v155_v29, %v153_v23  ;;  %v154_v37 = vadd.f32 0.05, %v152_v32 }
 0x11b   :  { %v213_v38 = vmul.f32 %v211_v34, %v211_v34  ;;  %v210_v41 = vadd.f32 0.32, %v208_v36 }
 0x11c   :  { %v179_v40 = vmul.f32 120.0, %v157_v35  ;;  %v156_v42 = vmul.f32 %v154_v37, %v154_v37 }
 0x11d   :  { %v215_v45 = vmul.f32 36.0, %v213_v38  ;;  %v212_v47 = vmul.f32 %v210_v41, %v210_v41 }
 0x11e   :  { %v181_v46 = vmul.f32 %v179_v40, %v177_v39  ;;  %v158_v50 = vmul.f32 %v156_v42, %v154_v37 }
 0x11f   :  { %v214_v52 = vmul.f32 %v212_v47, %v212_v47  ;;  %v219_v53 = vmul.f32 %v323_v48, %v215_v45 }
 0x120   :  { %v185_v51 = vmul.f32 %v321_v44, %v181_v46  ;;  %v180_v55 = vmul.f32 120.0, %v158_v50 }
 0x121   :  { %v216_v56 = vmul.f32 36.0, %v214_v52 }
 0x122   :  { %v225_v58 = vadd.f32 %v219_v53, %v185_v51  ;;  %v182_v59 = vmul.f32 %v180_v55, %v178_v54 }
 0x123   :  { %v220_v2 = vmul.f32 %v324_v61, %v216_v56 }
 0x124   :  { %v227_v63 = vadd.f32 %v225_v58, %v223_v57  ;;  %v186_v1 = vmul.f32 %v322_v60, %v182_v59 }
 0x126   :  { %v229_v3 = vadd.f32 %v227_v63, %v543_v6  ;;  %v226_v5 = vadd.f32 %v220_v2, %v186_v1 }
 0x128   :  { %v231_v7 = vadd.f32 0.013475894, %v229_v3  ;;  %v228_v8 = vadd.f32 %v226_v5, %v224_v4 }
 0x12a   :  { %v233_v9 = vmul.f32 0.005, %v231_v7  ;;  %v230_v10 = vadd.f32 %v228_v8, %v547_v11 }
 0x12c   :  { %v235_v12 = vadd.f32 -65.0, %v233_v9  ;;  %v232_v13 = vadd.f32 0.013475894, %v230_v10  ;;  %v243_v17 = vmul.f32 0.5, %v233_v9 }
 0x12e   :  { %vm237_vm2 = vcmp.ge.f32.partialorder %v235_v12, -50.0  ;;  %v234_v14 = vmul.f32 0.005, %v232_v13 }
 0x12f   :  { %v327_v15 = vsel %vm237_vm2, 1.0, %v498_v0 }
 0x130   :  { %v245_v16 = vmul.f32 0.1, %v327_v15  ;;  %vm251_vm3 = vcmp.gt.f32.partialorder %v327_v15, 0.5  ;;  %v236_v18 = vadd.f32 -65.0, %v234_v14  ;;  %v244_v23 = vmul.f32 0.5, %v234_v14 }
 0x131   :  { %v253_v19 = vsel %vm251_vm3, -65.0, %v235_v12 }
 0x132   :  { %265 = vst [vmem:[#allocation8] sm:$0xff] %v253_v19  ;;  %v247_v6 = vadd.f32 %v245_v16, %v243_v17  ;;  %vm238_vm4 = vcmp.ge.f32.partialorder %v236_v18, -50.0 }
 0x133   :  { %v328_v11 = vsel %vm238_vm4, 1.0, %v498_v0 }
 0x134   :  { %v249_v20 = vmul.f32 0.001, %v247_v6  ;;  %v246_v21 = vmul.f32 0.1, %v328_v11  ;;  %vm252_vm5 = vcmp.gt.f32.partialorder %v328_v11, 0.5  ;;  %v334_v22 = vpack.c.bf16 %v328_v11, %v327_v15 }
 0x135   :  { %v254_v24 = vsel %vm252_vm5, -65.0, %v236_v18 }
 0x136   :  { %267 = vst [vmem:[#allocation10] sm:$0xff] %v249_v20  ;;  %266 = vst [vmem:[#allocation8 + $0x8] sm:$0xff] %v254_v24  ;;  %v248_v25 = vadd.f32 %v246_v21, %v244_v23 }
 0x137   :  { %335 = vst [vmem:[#allocation7] sm:$0xff] %v334_v22  }
 0x138   :  { %435 = shalt.err (!%p432_p0)
}
 0x139   :  { %292 = dma.vmem_to_hbm [thread:$0]  %s287_s1, 256, %s593_s3, [#allocation9], %s493_s18, %s493_s18, %s494_s19  }
 0x13a   :  { %s444_s10 = scalar_lea.vmem %s275_s30, 128  ;;  %p449_p2 = scmp.lt.s32.totalorder %s275_s30, %s275_s30 }
 0x13b   :  { %p445_p1 = scmp.ne.s32.totalorder %s275_s30, %s444_s10  ;;  %p450_p3 = scmp.lt.s32.totalorder %s444_s10, %s444_s10 }
 0x13d   :  { %p451_p4 = por %p450_p3, %p449_p2 }
 0x13f   :  { %p452_p5 = pnand %p451_p4, %p445_p1 }
 0x141   :  { %455 = shalt.err (!%p452_p5)
}
 0x142   :  { %280 = dma.vmem_to_hbm [thread:$0]  %s275_s30, 128, %s592_s2, [#allocation4], %s496_s25, %s496_s25, %s497_s26   ;;  %v250_v0 = vmul.f32 0.001, %v248_v25 }
 0x143   :  { %s464_s3 = scalar_lea.vmem %s565_s6, 256  ;;  %p469_p7 = scmp.lt.s32.totalorder %s565_s6, %s565_s6 }
 0x144   :  { %268 = vst [vmem:[#allocation10 + $0x8] sm:$0xff] %v250_v0  ;;  %p465_p6 = scmp.ne.s32.totalorder %s565_s6, %s464_s3  ;;  %p470_p8 = scmp.lt.s32.totalorder %s464_s3, %s464_s3 }
 0x146   :  { %p471_p9 = por %p470_p8, %p469_p7 }
 0x148   :  { %p472_p10 = pnand %p471_p9, %p465_p6 }
 0x14a   :  { %475 = shalt.err (!%p472_p10)
}
 0x14b   :  { %304 = dma.vmem_to_hbm [thread:$0]  %s565_s6, 256, %s594_s4, [#allocation9], %s493_s18, %s493_s18, %s494_s19  }
 0x14c   :  { %488 = dma.done.wait [#allocation4], 128  }
 0x14d   :  { %489 = vsyncadd [#allocation4], 4294967168 }
 0x14e   :  { %490 = dma.done.wait [#allocation9], 512  }
 0x14f   :  { %491 = vsyncadd [#allocation9], 4294966784 }
 0x150   :  { %314 = vsyncpa [#allocation3], 1 }
 0x151   :  { %315 = vsyncpa [#allocation6], 1 }
 0x152   :  { %316 = vsyncpa [#allocation4], 1 }
 0x153   :  { %317 = vsyncpa [#allocation9], 1 }

</bundles_post_ra>
